<compile_context>
chip_gen: v7x
topology: tpu7x:2x2x1
jax: 0.10.0
libtpu: 0.0.40
codegen_flags: <defaults>
</compile_context>

<pallas_src>
import jax
import jax.numpy as jnp
from jax.experimental import pallas as pl
from jax.experimental.pallas import tpu as pltpu


def _round_up(n, m):
    return (n + m - 1) // m * m


def _vmem_plan():
    """Per-generation VMEM plan -> (bytes per x pipeline buffer, vmem_limit_bytes)."""
    phys = 64 << 20                       # conservative default = v7x physical VMEM
    try:
        info = pltpu.get_tpu_info()
        phys = int(getattr(info, "vmem_capacity_bytes", phys)) or phys
    except Exception:
        pass
    # ~48 MiB total on v7x (64 MiB phys), ~80 MiB on v5e/v6e (128 MiB phys).
    total = min((phys * 3) // 4, 80 << 20)
    # 2 pipeline buffers for x + ~2 tile-sized in-kernel temporaries + slack.
    per_x_buf = total // 5
    return per_x_buf, total


def lr_kernel(b_ref, x_ref, w_ref, o_ref):
    """One batch tile of sigmoid(x @ W^T + b).

    b_ref: (1,)          SMEM  scalar bias
    x_ref: (TILE_B, C)   VMEM  current batch tile
    w_ref: (1, C)        VMEM  lane-dense weight row
    o_ref: (1, TILE_B)   VMEM  lane-dense output row
    """
    x = x_ref[...]                       # (TB, C)
    w = w_ref[...]                       # (1, C), broadcast over rows
    p = x * w                            # VPU elementwise
    tb, c = p.shape

    # Fold the feature dim down to 128 lanes with aligned VPU adds (no XLU).
    if c > 128 and c % 128 == 0 and c <= 4096:
        acc = p[:, 0:128]
        for j in range(1, c // 128):
            acc = acc + p[:, j * 128:(j + 1) * 128]
        p = acc

    if tb % 128 == 0 and p.shape[1] == 128:
        # Row-sum as one aligned XLU transpose + sublane-direction adds: far fewer
        # XLU ops than a per-row rotate-reduce tree, and the result is already
        # lane-major so the (1, TILE_B) store needs no relayout.
        logits = jnp.sum(p.T, axis=0, keepdims=True)          # (1, TB)
    else:
        # Small / irregular tiles: plain lane reduce (cheap at these sizes).
        logits = jnp.sum(p, axis=-1).reshape(1, tb)

    o_ref[...] = jax.nn.sigmoid(logits + b_ref[0]).astype(o_ref.dtype)


def lr_forward(x, weight, bias):
    """sigmoid(x @ weight.T + bias); x:(B,C) f32, weight:(1,C) f32, bias:(1,) f32."""
    B, C = x.shape
    per_x_buf, vmem_limit = _vmem_plan()

    bytes_per_row = C * x.dtype.itemsize
    cap_rows = max(128, (per_x_buf // max(bytes_per_row, 1)) // 128 * 128)

    if B <= 128:
        tile_b = B                                   # single full-dim tile
    else:
        # >= 2 tiles so both v7x TensorCores get grid work; multiple of 128 keeps
        # the x block and the lane-dense output block (8,128)-legal; the ragged
        # edge is handled by Pallas partial blocks (masked writes), no jnp.pad.
        half = _round_up(pl.cdiv(B, 2), 128)
        tile_b = max(128, min(cap_rows, half))
    num_tiles = pl.cdiv(B, tile_b)
    # TODO(synk): for very wide C (where even a 128-row tile exceeds the VMEM
    # budget), add an inner 'arbitrary' grid axis over C with a scratch accumulator.

    out_row = pl.pallas_call(
        lr_kernel,
        out_shape=jax.ShapeDtypeStruct((1, B), jnp.float32),
        grid=(num_tiles,),
        in_specs=[
            pl.BlockSpec(memory_space=pltpu.SMEM),              # bias scalar
            pl.BlockSpec((tile_b, C), lambda i: (i, 0)),        # x batch tile (pipelined)
            pl.BlockSpec((1, C), lambda i: (0, 0)),             # weight row (VMEM-resident)
        ],
        out_specs=pl.BlockSpec((1, tile_b), lambda i: (0, i)),  # lane-dense output row
        compiler_params=pltpu.CompilerParams(
            dimension_semantics=("parallel",),
            vmem_limit_bytes=int(vmem_limit)),
        cost_estimate=pl.CostEstimate(
            flops=2 * B * C,
            transcendentals=B,
            bytes_accessed=4 * (B * C + C + B)),
    )(bias.reshape(1).astype(jnp.float32), x, weight)

    # (1, B) lane-dense slab -> (B, 1), same as sigmoid(nn.Linear(C, 1)(x)).
    return out_row.reshape(B, 1)


if __name__ == "__main__":
    key = jax.random.PRNGKey(0)
    kx, kw, kb, kx2, kx3, kw3 = jax.random.split(key, 6)

    # --- primary: module-sized small shape (batch=8, in_channel=32) ---
    B, C = 8, 32
    x = jax.random.normal(kx, (B, C), dtype=jnp.float32)
    bound = 1.0 / (C ** 0.5)                     # PyTorch-style U(-1/sqrt(C), 1/sqrt(C))
    weight = jax.random.uniform(kw, (1, C), minval=-bound, maxval=bound,
                                dtype=jnp.float32)
    bias = jax.random.uniform(kb, (1,), minval=-bound, maxval=bound,
                              dtype=jnp.float32)

    out = jax.block_until_ready(lr_forward(x, weight, bias))
    ref = jax.nn.sigmoid(x @ weight.T + bias)
    assert out.shape == (B, 1)
    assert jnp.allclose(out, ref, atol=1e-5, rtol=1e-5)

    # --- ragged multi-tile path (2 tiles, no padding), transpose-reduce, C=128 ---
    B2, C2 = 300, 128
    x2 = jax.random.normal(kx2, (B2, C2), dtype=jnp.float32)
    w2 = jax.random.uniform(kw, (1, C2), minval=-bound, maxval=bound,
                            dtype=jnp.float32)
    out2 = jax.block_until_ready(lr_forward(x2, w2, bias))
    ref2 = jax.nn.sigmoid(x2 @ w2.T + bias)
    assert out2.shape == (B2, 1)
    assert jnp.allclose(out2, ref2, atol=1e-5, rtol=1e-5)

    # --- feature-fold path (C=256 -> 128 lanes) on a ragged 2-tile grid ---
    B3, C3 = 260, 256
    x3 = jax.random.normal(kx3, (B3, C3), dtype=jnp.float32)
    w3 = jax.random.uniform(kw3, (1, C3), minval=-bound, maxval=bound,
                            dtype=jnp.float32)
    out3 = jax.block_until_ready(lr_forward(x3, w3, bias))
    ref3 = jax.nn.sigmoid(x3 @ w3.T + bias)
    assert out3.shape == (B3, 1)
    assert jnp.allclose(out3, ref3, atol=1e-5, rtol=1e-5)

    print("KERNEL_OK")
</pallas_src>

<mosaic_0001>
module attributes {stable_mosaic.version = 11 : i64} {
  func.func @lr_kernel(%arg0: i32, %arg1: memref<1xf32, #tpu.memory_space<smem>>, %arg2: memref<8x32xf32, #tpu.memory_space<vmem>>, %arg3: memref<1x32xf32, #tpu.memory_space<vmem>>, %arg4: memref<1x8xf32, #tpu.memory_space<vmem>>) attributes {dimension_semantics = [#tpu.dimension_semantics<parallel>], iteration_bounds = array<i64: 1>, scalar_prefetch = 0 : i64, scratch_operands = 0 : i64, tpu.core_type = #tpu.core_type<tc>, window_params = [{transform_indices = @transform_0, window_bounds = array<i64: 1>}, {transform_indices = @transform_1, window_bounds = array<i64: 8, 32>}, {pipeline_mode = #tpu.pipeline_mode<synchronous>, transform_indices = @transform_2, window_bounds = array<i64: 1, 32>}, {transform_indices = @transform_3, window_bounds = array<i64: 1, 8>}]} {
    %c0 = arith.constant 0 : index
    %c0_0 = arith.constant 0 : index
    %0 = vector.load %arg2[%c0, %c0_0] : memref<8x32xf32, #tpu.memory_space<vmem>>, vector<8x32xf32>
    %c0_1 = arith.constant 0 : index
    %c0_2 = arith.constant 0 : index
    %1 = vector.load %arg3[%c0_1, %c0_2] : memref<1x32xf32, #tpu.memory_space<vmem>>, vector<1x32xf32>
    %2 = vector.broadcast %1 : vector<1x32xf32> to vector<8x32xf32>
    %3 = arith.mulf %0, %2 : vector<8x32xf32>
    %cst = arith.constant dense<0.000000e+00> : vector<8xf32>
    %4 = vector.multi_reduction <add>, %3, %cst [1] : vector<8x32xf32> to vector<8xf32>
    %5 = vector.shape_cast %4 : vector<8xf32> to vector<1x8xf32>
    %c0_3 = arith.constant 0 : index
    %6 = memref.load %arg1[%c0_3] : memref<1xf32, #tpu.memory_space<smem>>
    %7 = vector.broadcast %6 : f32 to vector<1x8xf32>
    %8 = arith.addf %5, %7 : vector<1x8xf32>
    %9 = arith.negf %8 : vector<1x8xf32>
    %10 = math.exp %9 : vector<1x8xf32>
    %cst_4 = arith.constant 1.000000e+00 : f32
    %11 = vector.broadcast %cst_4 : f32 to vector<1x8xf32>
    %12 = arith.addf %11, %10 : vector<1x8xf32>
    %13 = arith.divf %11, %12 : vector<1x8xf32>
    %c0_5 = arith.constant 0 : index
    %c0_6 = arith.constant 0 : index
    %14 = vector.load %arg4[%c0_5, %c0_6] : memref<1x8xf32, #tpu.memory_space<vmem>>, vector<1x8xf32>
    tpu.vector_store %arg4[%c0_5, %c0_6], %13 {strides = array<i32>} : memref<1x8xf32, #tpu.memory_space<vmem>>, vector<1x8xf32>,
    return
  }
  func.func @transform_0(%arg0: i32) -> i32 {
    %c0_i32 = arith.constant 0 : i32
    %c0_i32_0 = arith.constant 0 : i32
    return %c0_i32 : i32
  }
  func.func @transform_1(%arg0: i32) -> (i32, i32) {
    %c0_i32 = arith.constant 0 : i32
    %c0_i32_0 = arith.constant 0 : i32
    return %arg0, %c0_i32 : i32, i32
  }
  func.func @transform_2(%arg0: i32) -> (i32, i32) {
    %c0_i32 = arith.constant 0 : i32
    %c0_i32_0 = arith.constant 0 : i32
    %c0_i32_1 = arith.constant 0 : i32
    return %c0_i32, %c0_i32_0 : i32, i32
  }
  func.func @transform_3(%arg0: i32) -> (i32, i32) {
    %c0_i32 = arith.constant 0 : i32
    %c0_i32_0 = arith.constant 0 : i32
    return %c0_i32, %arg0 : i32, i32
  }
}

</mosaic_0001>

<bundles_post_ra>
// kernel: tpu_custom_call.1
= control target key start
LH: loop header
LB: loop body
LE: loop exit
PB: predicated region body
PF: predicated region fallthrough
CT: control target
= control target key end

     0   :  { %9 = vsyncpa [#allocation4], 0  ;;  %s183_s0 = inlined_call_operand.<no memory space> [shape: f32[1], index: 0, kind: input, shape index: {}]   ;;  %s184_s1 = inlined_call_operand.hbm [shape: f32[8,32], index: 1, kind: input, shape index: {}]   ;;  %s185_s2 = inlined_call_operand.vmem [shape: f32[1,32], index: 2, kind: input, shape index: {}]   ;;  %s186_s3 = inlined_call_operand.hbm [shape: f32[1,8], index: 3, kind: output, shape index: {}]  }
   0x1   :  { %10 = vsyncpa [#allocation5], 0  ;;  %s131_s12 = smov [#allocation3]   ;;  %s83_s16 = scalar_lea.hbm %s184_s1, 128 }
   0x2   :  { %s19_s13 = sshll.u32 %s131_s12, 4  ;;  %p84_p0 = scmp.ne.s32.totalorder %s184_s1, %s83_s16  ;;  %s20_s13 = int_to_ptr.vmem [resolvable:$true] %s19_s13 }
   0x3   :  { %p87_p1 = scmp.lt.u32.totalorder %s83_s16, %s184_s1 }
   0x5   :  { %p89_p2 = pnand %p87_p1, %p84_p0 }
   0x7   :  { %92 = shalt.err (!%p89_p2)
}
   0x8   :  { %s93_s21 = scalar_lea.vmem %s20_s13, 128  ;;  %p98_p4 = scmp.lt.s32.totalorder %s20_s13, %s20_s13 }
   0x9   :  { %p94_p3 = scmp.ne.s32.totalorder %s20_s13, %s93_s21  ;;  %p99_p5 = scmp.lt.s32.totalorder %s93_s21, %s93_s21 }
   0xb   :  { %p100_p6 = por %p99_p5, %p98_p4 }
   0xd   :  { %p101_p7 = pnand %p100_p6, %p94_p3 }
   0xf   :  { %104 = shalt.err (!%p101_p7)
}
  0x10   :  { %22 = dma.hbm_to_vmem [thread:$0]  %s184_s1, 128, %s20_s13, [#allocation4]  }
  0x11   :  { %127 = dma.done.wait [#allocation4], 128  }
  0x12   :  { %128 = vsyncadd [#allocation4], 4294967168  ;;  %v28_v0 = vld [vmem:[#allocation3] sm:$0xff]  ;;  %vm37_vm0 = vcmask 261120   ;;  %v42_v4 = vstv %s183_s0  ;;  %v51_v10 = vlaneseq  ;;  %s132_s1 = smov [#allocation6]   ;;  %vm58_vm1 = vcmask 57344  }
  0x13   :  { %v75_v1 = vld [vmem:[%s185_s2] ss:$0 sm:$0xff]  ;;  %s66_s2 = sshll.u32 %s132_s1, 4  ;;  %s67_s2 = int_to_ptr.vmem [resolvable:$true] %s66_s2 }
  0x14   :  { %v36_v2 = vmul.f32 %v75_v1, %v28_v0  ;;  %v52_v11 = vand.u32 127, %v51_v10  ;;  %v54_v12 = vshrl.u32 %v51_v10, 7  ;;  %s105_s28 = scalar_lea.vmem %s67_s2, 16  ;;  %s109_s0 = scalar_lea.vmem %s67_s2, 32 }
  0x15   :  { %p106_p8 = scmp.ne.s32.totalorder %s67_s2, %s105_s28  ;;  %p110_p9 = scmp.lt.s32.totalorder %s67_s2, %s67_s2 }
  0x16   :  { %v38_v3 = vsel %vm37_vm0, %v36_v2, 0.0  ;;  %v55_v13 = vsub.s32 %v52_v11, %v54_v12  ;;  %p111_p10 = scmp.lt.s32.totalorder %s109_s0, %s105_s28 }
  0x17   :  { %39 = vadd.xlane.f32.xlu0 %v38_v3 }
  0x18   :  { %p112_p11 = por %p111_p10, %p110_p9 }
  0x1a   :  { %p113_p12 = pnand %p112_p11, %p106_p8 }
  0xa4   :  { %v40_v5 = vpop.xlane.xlu0 %39 }
  0xa5   :  { %v43_v6 = vadd.f32 %v42_v4, %v40_v5 }
  0xa7   :  { %v76_v7 = vmul.f32 -1.442695, %v43_v6 }
  0xa9   :  { %79 = vpow2.f32 %v76_v7 }
  0xb3   :  { %v80_v8 = vpop.eup %79 }
  0xb4   :  { %v47_v9 = vadd.f32 1.0, %v80_v8 }
  0xb6   :  { %81 = vrcp.f32 %v47_v9 }
  0xc0   :  { %v82_v14 = vpop.eup %81 }
  0xc1   :  { %v56_v15 = vrot.slane %v82_v14, %v55_v13 }
  0xc3   :  { %59 = vst.msk [vmem:[#allocation6] sm:$0x1] %vm58_vm1, %v56_v15 }
  0xc4   :  { %116 = shalt.err (!%p113_p12)
}
  0xc5   :  { %s117_s4 = scalar_lea.hbm %s186_s3, 16 }
  0xc6   :  { %p118_p13 = scmp.ne.s32.totalorder %s186_s3, %s117_s4  ;;  %p121_p0 = scmp.lt.u32.totalorder %s117_s4, %s186_s3 }
  0xc8   :  { %p123_p1 = pnand %p121_p0, %p118_p13 }
  0xca   :  { %126 = shalt.err (!%p123_p1)
}
  0xcb   :  { %69 = dma.vmem_to_hbm [thread:$0]  %s67_s2, 16, %s186_s3, [#allocation5]  }
  0xcc   :  { %129 = dma.done.wait [#allocation5], 16  }
  0xcd   :  { %130 = vsyncadd [#allocation5], 4294967280 }
  0xce   :  { %73 = vsyncpa [#allocation4], 1 }
  0xcf   :  { %74 = vsyncpa [#allocation5], 1 }

</bundles_post_ra>
